<compile_context>
chip_gen: v5e
topology: v5e:2x2
jax: 0.10.0
libtpu: 0.0.40
codegen_flags: <defaults>
</compile_context>

<pallas_src>
import functools

import jax
import jax.numpy as jnp
import numpy as np
from jax.experimental import pallas as pl
from jax.experimental.pallas import tpu as pltpu


_VMEM = pl.BlockSpec(memory_space=pltpu.MemorySpace.VMEM)
_VMEM_LIMIT = 32 * 1024 * 1024
# Keep the fused working set comfortably under the scoped VMEM limit (v7x has 64 MiB total).
_FUSED_VMEM_BUDGET = 20 * 1024 * 1024


def _round_up(x, m):
    return ((x + m - 1) // m) * m


def _tile_plan(n):
    """Returns (n_pad, tm, tk) for the tiled A@X aggregation."""
    n_pad = _round_up(max(n, 1), 128)
    if n_pad <= 512:
        return n_pad, n_pad, n_pad          # single tile
    n_pad = _round_up(n, 512)
    return n_pad, 256, 512                  # bf16 A tile = 256 KiB, safe on v7x's 64 MiB VMEM


def _fused_footprint_bytes(n_pad, hidden, num_layers):
    """Rough VMEM footprint of the fused kernel (A + x + agg/out temporaries + weights)."""
    a_bytes = n_pad * n_pad * 2                        # bf16 adjacency, resident
    act_bytes = 4 * n_pad * hidden * 4                 # x, agg, out, output (generous, f32)
    w_bytes = num_layers * (2 * hidden * hidden + hidden) * 4
    return a_bytes + act_bytes + w_bytes


# ----------------------------- Pallas kernels ------------------------------ #

def sage_conv_tiled_kernel(a_ref, xk_ref, xr_ref, wl_ref, wr_ref, b_ref, o_ref,
                           acc_ref, *, apply_relu):
    """One SAGEConv layer, tiled over (row tile i, K chunk k).

    a_ref : [TM, TK]   bf16, row-normalized adjacency tile
    xk_ref: [TK, Cin]  bf16, node features for this K chunk (aggregation operand)
    xr_ref: [TM, Cin]  bf16, node features for this row tile (root/self operand)
    wl_ref: [Cin, H]   f32 neighbor transform, bl in b_ref [1, H]
    wr_ref: [Cin, H]   f32 root transform (no bias)
    o_ref : [TM, H]    bf16
    acc_ref: [TM, Cin] f32 accumulator for A@X
    """
    k = pl.program_id(1)

    @pl.when(k == 0)
    def _():
        acc_ref[...] = jnp.zeros_like(acc_ref)

    acc_ref[...] += jnp.dot(a_ref[...], xk_ref[...], preferred_element_type=jnp.float32)

    @pl.when(k == pl.num_programs(1) - 1)
    def _():
        out = jnp.dot(acc_ref[...], wl_ref[...], preferred_element_type=jnp.float32)
        out = out + jnp.dot(xr_ref[...].astype(jnp.float32), wr_ref[...],
                            preferred_element_type=jnp.float32)
        out = out + b_ref[...]
        if apply_relu:
            out = jnp.maximum(out, 0.0)      # f32 epilogue (v5e has no bf16 VPU)
        o_ref[...] = out.astype(o_ref.dtype)


def sage_fused_kernel(a_ref, x_ref, wl_ref, wr_ref, b_ref, o_ref, *, num_layers):
    """All SAGEConv layers fused: A stays VMEM-resident, streamed from HBM once.

    a_ref : [Np, Np]     bf16
    x_ref : [Np, H]      bf16
    wl_ref: [L, H, H] f32, wr_ref: [L, H, H] f32, b_ref: [L, 1, H] f32
    o_ref : [Np, H]      bf16
    """
    a = a_ref[...]
    x = x_ref[...]
    for layer in range(num_layers):
        agg = jnp.dot(a, x, preferred_element_type=jnp.float32)
        out = jnp.dot(agg, wl_ref[layer], preferred_element_type=jnp.float32)
        out = out + jnp.dot(x.astype(jnp.float32), wr_ref[layer],
                            preferred_element_type=jnp.float32)
        out = out + b_ref[layer]
        if layer < num_layers - 1:
            out = jnp.maximum(out, 0.0)
        x = out.astype(jnp.bfloat16)
    o_ref[...] = x


def readout_kernel(xs_ref, xd_ref, w1_ref, b1_ref, w2_ref, b2_ref, o_ref):
    """Center-pair readout: lin2(relu(lin1(x_src * x_dst))), lane-dense (G, 128) output."""
    h = xs_ref[...].astype(jnp.float32) * xd_ref[...].astype(jnp.float32)
    h = jnp.dot(h, w1_ref[...], preferred_element_type=jnp.float32) + b1_ref[...]
    h = jnp.maximum(h, 0.0)
    o_ref[...] = jnp.dot(h, w2_ref[...], preferred_element_type=jnp.float32) + b2_ref[...]


# ------------------------------ wrappers ----------------------------------- #

def sage_conv_tiled(a, x, w_l, w_r, b, *, apply_relu, tm, tk):
    n_pad = a.shape[0]
    cin = x.shape[1]
    h = w_l.shape[1]
    grid = (n_pad // tm, n_pad // tk)
    flops = 2 * n_pad * n_pad * cin + 4 * n_pad * cin * h
    bytes_accessed = (a.size * 2                      # A (bf16), dominant stream
                      + grid[0] * n_pad * cin * 2     # X re-read per row tile
                      + n_pad * cin * 2 + n_pad * h * 2
                      + (w_l.size + w_r.size + b.size) * 4)
    return pl.pallas_call(
        functools.partial(sage_conv_tiled_kernel, apply_relu=apply_relu),
        out_shape=jax.ShapeDtypeStruct((n_pad, h), jnp.bfloat16),
        grid_spec=pltpu.PrefetchScalarGridSpec(
            num_scalar_prefetch=0,
            grid=grid,
            in_specs=[
                pl.BlockSpec((tm, tk), lambda i, k: (i, k)),       # A tile
                pl.BlockSpec((tk, cin), lambda i, k: (k, 0)),      # X (K chunk)
                pl.BlockSpec((tm, cin), lambda i, k: (i, 0)),      # X (root rows)
                pl.BlockSpec((cin, h), lambda i, k: (0, 0)),       # W_l
                pl.BlockSpec((cin, h), lambda i, k: (0, 0)),       # W_r
                pl.BlockSpec((1, h), lambda i, k: (0, 0)),         # b_l
            ],
            out_specs=pl.BlockSpec((tm, h), lambda i, k: (i, 0)),
            scratch_shapes=[pltpu.VMEM((tm, cin), jnp.float32)],
        ),
        compiler_params=pltpu.CompilerParams(
            dimension_semantics=("parallel", "arbitrary"),
            vmem_limit_bytes=_VMEM_LIMIT,
        ),
        cost_estimate=pl.CostEstimate(flops=int(flops), transcendentals=0,
                                      bytes_accessed=int(bytes_accessed)),
    )(a, x, x, w_l, w_r, b)


def sage_fused(a, x, wl_stack, wr_stack, b_stack, *, num_layers):
    n_pad = a.shape[0]
    h = wl_stack.shape[-1]
    flops = num_layers * (2 * n_pad * n_pad * h + 4 * n_pad * h * h)
    bytes_accessed = (a.size * 2 + x.size * 2 + n_pad * h * 2
                      + (wl_stack.size + wr_stack.size + b_stack.size) * 4)
    return pl.pallas_call(
        functools.partial(sage_fused_kernel, num_layers=num_layers),
        out_shape=jax.ShapeDtypeStruct((n_pad, h), jnp.bfloat16),
        in_specs=[_VMEM] * 5,
        out_specs=_VMEM,
        compiler_params=pltpu.CompilerParams(vmem_limit_bytes=_VMEM_LIMIT),
        cost_estimate=pl.CostEstimate(flops=int(flops), transcendentals=0,
                                      bytes_accessed=int(bytes_accessed)),
    )(a, x, wl_stack, wr_stack, b_stack)


def readout(x_src, x_dst, w1, b1, w2, b2):
    g, h = x_src.shape
    out_cols = w2.shape[1]                                   # = 1
    # Pad lin2 to 128 output columns so the kernel's store is lane-dense (no vst.msk).
    w2p = jnp.zeros((h, 128), jnp.float32).at[:, :out_cols].set(w2)
    b2p = jnp.zeros((1, 128), jnp.float32).at[:, :out_cols].set(b2.reshape(1, -1))
    out = pl.pallas_call(
        readout_kernel,
        out_shape=jax.ShapeDtypeStruct((g, 128), jnp.float32),
        in_specs=[_VMEM] * 6,
        out_specs=_VMEM,
        compiler_params=pltpu.CompilerParams(vmem_limit_bytes=_VMEM_LIMIT),
    )(x_src, x_dst, w1, b1.reshape(1, -1), w2p, b2p)
    return out[:, :out_cols]


# ------------------------------ full model --------------------------------- #

def build_normalized_adjacency(edge_index, num_nodes_padded):
    """Dense row-normalized adjacency: A[dst, src] = 1/in_deg(dst); zero rows if no in-edges."""
    # TODO(synk): for large sparse graphs, replace the dense O(N^2) adjacency with an
    # edge-list segment-sum aggregation (scalar-prefetched edge offsets) inside Pallas.
    src, dst = edge_index
    a = jnp.zeros((num_nodes_padded, num_nodes_padded), jnp.float32).at[dst, src].add(1.0)
    deg = a.sum(axis=1, keepdims=True)
    a = a * jnp.where(deg > 0, 1.0 / jnp.maximum(deg, 1.0), 0.0)
    return a.astype(jnp.bfloat16)


def sage_forward(params, z, edge_index, batch_np, x=None, *, force_tiled=False):
    # Embedding lookup (gather glue).
    z_emb = jnp.take(params["z_embedding"], z, axis=0)
    if z_emb.ndim == 3:
        z_emb = z_emb.sum(axis=1)
    if x is None:
        x = z_emb
    x = x.astype(jnp.float32)

    num_nodes = x.shape[0]
    n_pad, tm, tk = _tile_plan(num_nodes)
    a = build_normalized_adjacency(edge_index, n_pad)
    x = jnp.pad(x, ((0, n_pad - num_nodes), (0, 0))).astype(jnp.bfloat16)

    convs = params["convs"]
    num_layers = len(convs)
    hidden = convs[0]["w_l"].shape[1]
    use_fused = (
        (not force_tiled)
        and (x.shape[1] == hidden)
        and (_fused_footprint_bytes(n_pad, hidden, num_layers) <= _FUSED_VMEM_BUDGET)
    )

    if use_fused:
        # Stream A into VMEM once for all layers.
        wl_stack = jnp.stack([c["w_l"] for c in convs])
        wr_stack = jnp.stack([c["w_r"] for c in convs])
        b_stack = jnp.stack([c["b_l"].reshape(1, -1) for c in convs])
        x = sage_fused(a, x, wl_stack, wr_stack, b_stack, num_layers=num_layers)
    else:
        for li, c in enumerate(convs):
            x = sage_conv_tiled(a, x, c["w_l"], c["w_r"], c["b_l"].reshape(1, -1),
                                apply_relu=(li < num_layers - 1), tm=tm, tk=tk)
        # F.dropout with training=False is the identity (eval mode).

    # np.unique(batch, return_index=True) equivalent (host-side glue, like the torch code).
    _, center_indices = np.unique(np.asarray(batch_np), return_index=True)
    center_indices = jnp.asarray(center_indices, jnp.int32)
    x_src = jnp.take(x, center_indices, axis=0)
    x_dst = jnp.take(x, center_indices + 1, axis=0)

    return readout(x_src, x_dst, params["lin1_w"], params["lin1_b"],
                   params["lin2_w"], params["lin2_b"])


# --------------------------- pure-JAX reference ----------------------------- #

def sage_reference(params, z, edge_index, batch_np):
    x = jnp.take(params["z_embedding"], z, axis=0)
    if x.ndim == 3:
        x = x.sum(axis=1)
    n = x.shape[0]
    src, dst = edge_index
    a = jnp.zeros((n, n), jnp.float32).at[dst, src].add(1.0)
    deg = a.sum(axis=1, keepdims=True)
    a = a * jnp.where(deg > 0, 1.0 / jnp.maximum(deg, 1.0), 0.0)
    convs = params["convs"]
    for li, c in enumerate(convs):
        out = (a @ x) @ c["w_l"] + c["b_l"] + x @ c["w_r"]
        x = jnp.maximum(out, 0.0) if li < len(convs) - 1 else out
    _, ci = np.unique(np.asarray(batch_np), return_index=True)
    ci = jnp.asarray(ci, jnp.int32)
    h = jnp.take(x, ci, axis=0) * jnp.take(x, ci + 1, axis=0)
    h = jnp.maximum(h @ params["lin1_w"] + params["lin1_b"], 0.0)
    return h @ params["lin2_w"] + params["lin2_b"]


# --------------------------------- params ----------------------------------- #

def init_params(key, input_channels, hidden_channels, num_layers, max_z):
    keys = jax.random.split(key, 4 + 2 * num_layers)
    ki = iter(keys)

    def dense(k, fan_in, fan_out):
        bound = 1.0 / np.sqrt(fan_in)
        return jax.random.uniform(k, (fan_in, fan_out), jnp.float32, -bound, bound)

    params = {"z_embedding": jax.random.normal(next(ki), (max_z, hidden_channels), jnp.float32)}
    convs = []
    cin = input_channels
    for _ in range(num_layers):
        convs.append({
            "w_l": dense(next(ki), cin, hidden_channels),
            "b_l": jnp.zeros((hidden_channels,), jnp.float32),
            "w_r": dense(next(ki), cin, hidden_channels),
        })
        cin = hidden_channels
    params["convs"] = convs
    params["lin1_w"] = dense(next(ki), hidden_channels, hidden_channels)
    params["lin1_b"] = jnp.zeros((hidden_channels,), jnp.float32)
    params["lin2_w"] = dense(next(ki), hidden_channels, 1)
    params["lin2_b"] = jnp.zeros((1,), jnp.float32)
    return params


# --------------------------------- main ------------------------------------ #

if __name__ == "__main__":
    input_channels = 32   # must equal hidden_channels on the x=None path
    hidden_channels = 32
    num_layers = 3
    max_z = 10

    num_graphs = 2
    nodes_per_graph = 8
    num_nodes = num_graphs * nodes_per_graph
    num_edges = 40

    key = jax.random.PRNGKey(0)
    k_param, k_z, k_src, k_dst = jax.random.split(key, 4)

    params = init_params(k_param, input_channels, hidden_channels, num_layers, max_z)

    z = jax.random.randint(k_z, (num_nodes,), 0, max_z, dtype=jnp.int32)
    src = jax.random.randint(k_src, (num_edges,), 0, num_nodes, dtype=jnp.int32)
    dst = jax.random.randint(k_dst, (num_edges,), 0, num_nodes, dtype=jnp.int32)
    edge_index = jnp.stack([src, dst], axis=0)

    # batch assignment (sorted, like PyG DataLoader produces)
    batch_np = np.repeat(np.arange(num_graphs), nodes_per_graph)

    out_fused = jax.block_until_ready(sage_forward(params, z, edge_index, batch_np))
    out_tiled = jax.block_until_ready(
        sage_forward(params, z, edge_index, batch_np, force_tiled=True))
    ref = jax.block_until_ready(sage_reference(params, z, edge_index, batch_np))

    assert out_fused.shape == (num_graphs, 1)
    assert out_tiled.shape == (num_graphs, 1)
    assert bool(jnp.all(jnp.isfinite(out_fused))) and bool(jnp.all(jnp.isfinite(out_tiled)))

    tol = 0.05 + 0.05 * float(jnp.max(jnp.abs(ref)))   # bf16 streaming vs f32 reference
    assert float(jnp.max(jnp.abs(out_fused - ref))) < tol
    assert float(jnp.max(jnp.abs(out_tiled - ref))) < tol
    assert float(jnp.max(jnp.abs(out_fused - out_tiled))) < 1e-2

    print("KERNEL_OK")
</pallas_src>

<mosaic_0001>
module attributes {stable_mosaic.version = 11 : i64} {
  func.func @sage_fused_kernel(%arg0: memref<128x128xbf16, #tpu.memory_space<vmem>>, %arg1: memref<128x32xbf16, #tpu.memory_space<vmem>>, %arg2: memref<3x32x32xf32, #tpu.memory_space<vmem>>, %arg3: memref<3x32x32xf32, #tpu.memory_space<vmem>>, %arg4: memref<3x1x32xf32, #tpu.memory_space<vmem>>, %arg5: memref<128x32xbf16, #tpu.memory_space<vmem>>) attributes {dimension_semantics = [], scalar_prefetch = 0 : i64, scratch_operands = 0 : i64, tpu.core_type = #tpu.core_type<tc>} {
    %c0 = arith.constant 0 : index
    %c0_0 = arith.constant 0 : index
    %0 = vector.load %arg0[%c0, %c0_0] : memref<128x128xbf16, #tpu.memory_space<vmem>>, vector<128x128xbf16>
    %c0_1 = arith.constant 0 : index
    %c0_2 = arith.constant 0 : index
    %1 = vector.load %arg1[%c0_1, %c0_2] : memref<128x32xbf16, #tpu.memory_space<vmem>>, vector<128x32xbf16>
    %cst = arith.constant dense<0.000000e+00> : vector<128x32xf32>
    %2 = tpu.matmul %0, %1, %cst {dimension_numbers = #tpu.dot_dimension_numbers<[1], [0], [0], [1], [0, 0, 1, 1], [], []>} : vector<128x128xbf16>, vector<128x32xbf16>, vector<128x32xf32> -> vector<128x32xf32>
    %c0_3 = arith.constant 0 : index
    %c0_4 = arith.constant 0 : index
    %c0_5 = arith.constant 0 : index
    %3 = vector.load %arg2[%c0_3, %c0_4, %c0_5] : memref<3x32x32xf32, #tpu.memory_space<vmem>>, vector<1x32x32xf32>
    %4 = vector.shape_cast %3 : vector<1x32x32xf32> to vector<32x32xf32>
    %cst_6 = arith.constant dense<0.000000e+00> : vector<128x32xf32>
    %5 = tpu.matmul %2, %4, %cst_6 {dimension_numbers = #tpu.dot_dimension_numbers<[1], [0], [0], [1], [0, 0, 1, 1], [], []>} : vector<128x32xf32>, vector<32x32xf32>, vector<128x32xf32> -> vector<128x32xf32>
    %6 = arith.extf %1 : vector<128x32xbf16> to vector<128x32xf32>
    %c0_7 = arith.constant 0 : index
    %c0_8 = arith.constant 0 : index
    %c0_9 = arith.constant 0 : index
    %7 = vector.load %arg3[%c0_7, %c0_8, %c0_9] : memref<3x32x32xf32, #tpu.memory_space<vmem>>, vector<1x32x32xf32>
    %8 = vector.shape_cast %7 : vector<1x32x32xf32> to vector<32x32xf32>
    %cst_10 = arith.constant dense<0.000000e+00> : vector<128x32xf32>
    %9 = tpu.matmul %6, %8, %cst_10 {dimension_numbers = #tpu.dot_dimension_numbers<[1], [0], [0], [1], [0, 0, 1, 1], [], []>} : vector<128x32xf32>, vector<32x32xf32>, vector<128x32xf32> -> vector<128x32xf32>
    %10 = arith.addf %5, %9 : vector<128x32xf32>
    %c0_11 = arith.constant 0 : index
    %c0_12 = arith.constant 0 : index
    %c0_13 = arith.constant 0 : index
    %11 = vector.load %arg4[%c0_11, %c0_12, %c0_13] : memref<3x1x32xf32, #tpu.memory_space<vmem>>, vector<1x1x32xf32>
    %12 = vector.shape_cast %11 : vector<1x1x32xf32> to vector<1x32xf32>
    %13 = vector.broadcast %12 : vector<1x32xf32> to vector<128x32xf32>
    %14 = arith.addf %10, %13 : vector<128x32xf32>
    %cst_14 = arith.constant 0.000000e+00 : f32
    %15 = vector.broadcast %cst_14 : f32 to vector<128x32xf32>
    %16 = arith.maximumf %14, %15 : vector<128x32xf32>
    %17 = arith.truncf %16 : vector<128x32xf32> to vector<128x32xbf16>
    %cst_15 = arith.constant dense<0.000000e+00> : vector<128x32xf32>
    %18 = tpu.matmul %0, %17, %cst_15 {dimension_numbers = #tpu.dot_dimension_numbers<[1], [0], [0], [1], [0, 0, 1, 1], [], []>} : vector<128x128xbf16>, vector<128x32xbf16>, vector<128x32xf32> -> vector<128x32xf32>
    %c1 = arith.constant 1 : index
    %c0_16 = arith.constant 0 : index
    %c0_17 = arith.constant 0 : index
    %19 = vector.load %arg2[%c1, %c0_16, %c0_17] : memref<3x32x32xf32, #tpu.memory_space<vmem>>, vector<1x32x32xf32>
    %20 = vector.shape_cast %19 : vector<1x32x32xf32> to vector<32x32xf32>
    %cst_18 = arith.constant dense<0.000000e+00> : vector<128x32xf32>
    %21 = tpu.matmul %18, %20, %cst_18 {dimension_numbers = #tpu.dot_dimension_numbers<[1], [0], [0], [1], [0, 0, 1, 1], [], []>} : vector<128x32xf32>, vector<32x32xf32>, vector<128x32xf32> -> vector<128x32xf32>
    %22 = arith.extf %17 : vector<128x32xbf16> to vector<128x32xf32>
    %c1_19 = arith.constant 1 : index
    %c0_20 = arith.constant 0 : index
    %c0_21 = arith.constant 0 : index
    %23 = vector.load %arg3[%c1_19, %c0_20, %c0_21] : memref<3x32x32xf32, #tpu.memory_space<vmem>>, vector<1x32x32xf32>
    %24 = vector.shape_cast %23 : vector<1x32x32xf32> to vector<32x32xf32>
    %cst_22 = arith.constant dense<0.000000e+00> : vector<128x32xf32>
    %25 = tpu.matmul %22, %24, %cst_22 {dimension_numbers = #tpu.dot_dimension_numbers<[1], [0], [0], [1], [0, 0, 1, 1], [], []>} : vector<128x32xf32>, vector<32x32xf32>, vector<128x32xf32> -> vector<128x32xf32>
    %26 = arith.addf %21, %25 : vector<128x32xf32>
    %c1_23 = arith.constant 1 : index
    %c0_24 = arith.constant 0 : index
    %c0_25 = arith.constant 0 : index
    %27 = vector.load %arg4[%c1_23, %c0_24, %c0_25] : memref<3x1x32xf32, #tpu.memory_space<vmem>>, vector<1x1x32xf32>
    %28 = vector.shape_cast %27 : vector<1x1x32xf32> to vector<1x32xf32>
    %29 = vector.broadcast %28 : vector<1x32xf32> to vector<128x32xf32>
    %30 = arith.addf %26, %29 : vector<128x32xf32>
    %cst_26 = arith.constant 0.000000e+00 : f32
    %31 = vector.broadcast %cst_26 : f32 to vector<128x32xf32>
    %32 = arith.maximumf %30, %31 : vector<128x32xf32>
    %33 = arith.truncf %32 : vector<128x32xf32> to vector<128x32xbf16>
    %cst_27 = arith.constant dense<0.000000e+00> : vector<128x32xf32>
    %34 = tpu.matmul %0, %33, %cst_27 {dimension_numbers = #tpu.dot_dimension_numbers<[1], [0], [0], [1], [0, 0, 1, 1], [], []>} : vector<128x128xbf16>, vector<128x32xbf16>, vector<128x32xf32> -> vector<128x32xf32>
    %c2 = arith.constant 2 : index
    %c0_28 = arith.constant 0 : index
    %c0_29 = arith.constant 0 : index
    %35 = vector.load %arg2[%c2, %c0_28, %c0_29] : memref<3x32x32xf32, #tpu.memory_space<vmem>>, vector<1x32x32xf32>
    %36 = vector.shape_cast %35 : vector<1x32x32xf32> to vector<32x32xf32>
    %cst_30 = arith.constant dense<0.000000e+00> : vector<128x32xf32>
    %37 = tpu.matmul %34, %36, %cst_30 {dimension_numbers = #tpu.dot_dimension_numbers<[1], [0], [0], [1], [0, 0, 1, 1], [], []>} : vector<128x32xf32>, vector<32x32xf32>, vector<128x32xf32> -> vector<128x32xf32>
    %38 = arith.extf %33 : vector<128x32xbf16> to vector<128x32xf32>
    %c2_31 = arith.constant 2 : index
    %c0_32 = arith.constant 0 : index
    %c0_33 = arith.constant 0 : index
    %39 = vector.load %arg3[%c2_31, %c0_32, %c0_33] : memref<3x32x32xf32, #tpu.memory_space<vmem>>, vector<1x32x32xf32>
    %40 = vector.shape_cast %39 : vector<1x32x32xf32> to vector<32x32xf32>
    %cst_34 = arith.constant dense<0.000000e+00> : vector<128x32xf32>
    %41 = tpu.matmul %38, %40, %cst_34 {dimension_numbers = #tpu.dot_dimension_numbers<[1], [0], [0], [1], [0, 0, 1, 1], [], []>} : vector<128x32xf32>, vector<32x32xf32>, vector<128x32xf32> -> vector<128x32xf32>
    %42 = arith.addf %37, %41 : vector<128x32xf32>
    %c2_35 = arith.constant 2 : index
    %c0_36 = arith.constant 0 : index
    %c0_37 = arith.constant 0 : index
    %43 = vector.load %arg4[%c2_35, %c0_36, %c0_37] : memref<3x1x32xf32, #tpu.memory_space<vmem>>, vector<1x1x32xf32>
    %44 = vector.shape_cast %43 : vector<1x1x32xf32> to vector<1x32xf32>
    %45 = vector.broadcast %44 : vector<1x32xf32> to vector<128x32xf32>
    %46 = arith.addf %42, %45 : vector<128x32xf32>
    %47 = arith.truncf %46 : vector<128x32xf32> to vector<128x32xbf16>
    %c0_38 = arith.constant 0 : index
    %c0_39 = arith.constant 0 : index
    %48 = vector.load %arg5[%c0_38, %c0_39] : memref<128x32xbf16, #tpu.memory_space<vmem>>, vector<128x32xbf16>
    tpu.vector_store %arg5[%c0_38, %c0_39], %47 {strides = array<i32>} : memref<128x32xbf16, #tpu.memory_space<vmem>>, vector<128x32xbf16>,
    return
  }
}

</mosaic_0001>

<bundles_post_ra>
// kernel: tpu_custom_call.1
= control target key start
LH: loop header
LB: loop body
LE: loop exit
PB: predicated region body
PF: predicated region fallthrough
CT: control target
= control target key end

     0   :  { %10 = vsyncpa [#allocation3], 0  ;;  %s1891_s0 = inlined_call_operand.vmem [shape: bf16[128,128], index: 0, kind: input, shape index: {}]   ;;  %s1892_s1 = inlined_call_operand.vmem [shape: bf16[128,32], index: 1, kind: input, shape index: {}]   ;;  %s1893_s2 = inlined_call_operand.hbm [shape: f32[3,32,32], index: 2, kind: input, shape index: {}]   ;;  %s1894_s3 = inlined_call_operand.hbm [shape: f32[3,32,32], index: 3, kind: input, shape index: {}]   ;;  %s1895_s4 = inlined_call_operand.vmem [shape: f32[3,1,32], index: 4, kind: input, shape index: {}]   ;;  %s1896_s5 = inlined_call_operand.vmem [shape: bf16[128,32], index: 5, kind: output, shape index: {}]  }
   0x1   :  { %s20_s20 = sshll.u32 %s1893_s2, 4  ;;  %s21_s20 = int_to_ptr.hbm [resolvable:$true] %s20_s20 }
   0x2   :  { %11 = vsyncpa [#allocation5], 0  ;;  %s1480_s21 = smov [#allocation2]   ;;  %s33_s25 = sshll.u32 %s1894_s3, 4  ;;  %s34_s25 = int_to_ptr.hbm [resolvable:$true] %s33_s25 }
   0x3   :  { %s22_s22 = sshll.u32 %s1480_s21, 4  ;;  %s1481_s26 = smov 128   ;;  %s23_s22 = int_to_ptr.vmem [resolvable:$true] %s22_s22 }
   0x4   :  { %s1482_s27 = smov 8   ;;  %s1483_s28 = smov [#allocation4]  }
   0x5   :  { %28 = dma.hbm_to_vmem [thread:$0]  %s21_s20, 1536, %s23_s22, [#allocation3], %s1481_s26, %s1481_s26, %s1482_s27  }
   0x6   :  { %s35_s29 = sshll.u32 %s1483_s28, 4  ;;  %s36_s29 = int_to_ptr.vmem [resolvable:$true] %s35_s29 }
   0x7   :  { %41 = dma.hbm_to_vmem [thread:$0]  %s34_s25, 1536, %s36_s29, [#allocation5], %s1481_s26, %s1481_s26, %s1482_s27  }
   0x8   :  { %1476 = dma.done.wait [#allocation3], 1536  }
   0x9   :  { %1477 = vsyncadd [#allocation3], 4294965760 }
   0xa   :  { %1478 = dma.done.wait [#allocation5], 1536  }
   0xb   :  { %1479 = vsyncadd [#allocation5], 4294965760  ;;  %v1408_v0 = vld [vmem:[%s1892_s1 + $0x38] sm:$0xff]  ;;  %v1407_v1 = vld [vmem:[%s1892_s1 + $0x30] sm:$0xff]  ;;  %vm253_vm0 = vcmask 261120   ;;  %vm1208_vm1 = vcmask 257024  }
   0xc   :  { %180 = vmatpush.bf16.msra.mxu0 %v1408_v0  ;;  %v1406_v2 = vld [vmem:[%s1892_s1 + $0x28] sm:$0xff]  ;;  %v1405_v3 = vld [vmem:[%s1892_s1 + $0x20] sm:$0xff]  ;;  %v1404_v4 = vld [vmem:[%s1892_s1 + $0x18] sm:$0xff] }
   0xd   :  { %v1403_v5 = vld [vmem:[%s1892_s1 + $0x10] sm:$0xff]  ;;  %v1402_v6 = vld [vmem:[%s1892_s1 + $0x8] sm:$0xff]  ;;  %v1401_v7 = vld [vmem:[%s1892_s1] sm:$0xff] }
   0xe   :  { %v1547_v8 = vld [vmem:[%s1891_s0] sm:$0xff]  ;;  %v1553_v9 = vld [vmem:[%s1891_s0 + $0x8] sm:$0xff]  ;;  %v1559_v10 = vld [vmem:[%s1891_s0 + $0x10] sm:$0xff] }
   0xf   :  { %v252_v11 = vld [vmem:[#allocation4 + $0x18] sm:$0xff]  ;;  %v251_v12 = vld [vmem:[#allocation4 + $0x10] sm:$0xff]  ;;  %v250_v14 = vld [vmem:[#allocation4 + $0x8] sm:$0xff] }
  0x10   :  { %181 = vmatpush.bf16.msra.mxu0 %v1407_v1  ;;  %1409 = vmatpush.msra.mxu2 %v252_v11  ;;  %v74_v13 = vld [vmem:[%s1892_s1 + $0x18] sm:$0xff]   ;;  %v249_v15 = vld [vmem:[#allocation4] sm:$0xff]  ;;  %v78_v23 = vld [vmem:[%s1892_s1 + $0x28] sm:$0xff]  }
  0x11   :  { %314 = vmatpush.msra.mxu1 %v252_v11  ;;  %1410 = vmatpush.msra.mxu3 %v252_v11  ;;  %v239_v16 = vunpack.c.l.bf16 %v74_v13  ;;  %v1569_v17 = vld [vmem:[%s1891_s0 + $0x18] sm:$0xff]  ;;  %v240_v18 = vunpack.c.h.bf16 %v74_v13  ;;  %v76_v19 = vld [vmem:[%s1892_s1 + $0x20] sm:$0xff]   ;;  %v243_v24 = vunpack.c.l.bf16 %v78_v23  ;;  %v1591_v25 = vld [vmem:[%s1891_s0 + $0x28] sm:$0xff]  ;;  %v244_v26 = vunpack.c.h.bf16 %v78_v23 }
  0x12   :  { %1411 = vmatpush.msra.mxu2 %v251_v12  ;;  %v241_v20 = vunpack.c.l.bf16 %v76_v19  ;;  %v1580_v21 = vld [vmem:[%s1891_s0 + $0x20] sm:$0xff]  ;;  %v242_v22 = vunpack.c.h.bf16 %v76_v19  ;;  %v232_v27 = vld [vmem:[#allocation2 + $0x18] sm:$0xff]  ;;  %v231_v28 = vld [vmem:[#allocation2 + $0x10] sm:$0xff] }
  0x13   :  { %315 = vmatpush.msra.mxu1 %v251_v12  ;;  %1412 = vmatpush.msra.mxu3 %v251_v12  ;;  %v230_v29 = vld [vmem:[#allocation2 + $0x8] sm:$0xff]  ;;  %v1598_v30 = vld [vmem:[%s1891_s0 + $0x30] sm:$0xff]  ;;  %v229_v31 = vld [vmem:[#allocation2] sm:$0xff] }
  0x14   :  { %182 = vmatpush.bf16.msra.mxu0 %v1406_v2  ;;  %1413 = vmatpush.msra.mxu2 %v250_v14  ;;  %v68_v32 = vld [vmem:[%s1892_s1] sm:$0xff]   ;;  %v1609_v35 = vld [vmem:[%s1891_s0 + $0x38] sm:$0xff]  ;;  %v70_v36 = vld [vmem:[%s1892_s1 + $0x8] sm:$0xff]  }
  0x15   :  { %316 = vmatpush.msra.mxu1 %v250_v14  ;;  %1414 = vmatpush.msra.mxu3 %v250_v14  ;;  %v233_v33 = vunpack.c.l.bf16 %v68_v32  ;;  %v234_v34 = vunpack.c.h.bf16 %v68_v32  ;;  %v235_v37 = vunpack.c.l.bf16 %v70_v36  ;;  %v236_v38 = vunpack.c.h.bf16 %v70_v36  ;;  %v72_v40 = vld [vmem:[%s1892_s1 + $0x10] sm:$0xff]   ;;  %v82_v56 = vld [vmem:[%s1892_s1 + $0x38] sm:$0xff]  }
  0x16   :  { %1415 = vmatpush.msra.mxu2 %v249_v15  ;;  %v237_v41 = vunpack.c.l.bf16 %v72_v40  ;;  %v238_v43 = vunpack.c.h.bf16 %v72_v40  ;;  %v80_v50 = vld [vmem:[%s1892_s1 + $0x30] sm:$0xff]   ;;  %v247_v57 = vunpack.c.l.bf16 %v82_v56  ;;  %v248_v60 = vunpack.c.h.bf16 %v82_v56  ;;  %v598_v0 = vld [vmem:[#allocation4 + $0x38] sm:$0xff] }
  0x17   :  { %317 = vmatpush.msra.mxu1 %v249_v15  ;;  %1301 = vmatmul.msk.f32.vlgmr.msra.gmra.mxu2 %vm253_vm0, %v239_v16  ;;  %v245_v51 = vunpack.c.l.bf16 %v80_v50  ;;  %v246_v53 = vunpack.c.h.bf16 %v80_v50  ;;  %v597_v1 = vld [vmem:[#allocation4 + $0x30] sm:$0xff] }
  0x18   :  { %183 = vmatpush.bf16.msra.mxu0 %v1405_v3  ;;  %1416 = vmatpush.msra.mxu3 %v249_v15  ;;  %v596_v3 = vld [vmem:[#allocation4 + $0x28] sm:$0xff]  ;;  %v1663_v15 = vld [vmem:[%s1895_s4] ss:$0 sm:$0xff] }
  0x19   :  { %427 = vmatpush.msrb.mxu2 %v232_v27  ;;  %1295 = vmatmul.msk.f32.vlgmr.msra.gmra.mxu1 %vm253_vm0, %v233_v33 }
  0x1a   :  { %1307 = vmatmul.msk.f32.vlgmr.msra.gmra.mxu3 %vm253_vm0, %v245_v51  ;;  %659 = vmatpush.msrb.mxu1 %v598_v0 }
  0x1b   :  { %428 = vmatpush.msrb.mxu2 %v231_v28 }
  0x1c   :  { %184 = vmatpush.bf16.msra.mxu0 %v1404_v4  ;;  %660 = vmatpush.msrb.mxu1 %v597_v1 }
  0x1d   :  { %429 = vmatpush.msrb.mxu2 %v230_v29 }
  0x1e   :  { %661 = vmatpush.msrb.mxu1 %v596_v3 }
  0x1f   :  { %1302 = vmatmul.msk.f32.gmra.mxu2 %vm253_vm0, %v240_v18 }
  0x20   :  { %185 = vmatpush.bf16.msra.mxu0 %v1403_v5  ;;  %430 = vmatpush.msrb.mxu2 %v229_v31  ;;  %v595_v5 = vld [vmem:[#allocation4 + $0x20] sm:$0xff] }
  0x21   :  { %1296 = vmatmul.msk.f32.gmra.mxu1 %vm253_vm0, %v234_v34 }
  0x22   :  { %1308 = vmatmul.msk.f32.gmra.mxu3 %vm253_vm0, %v246_v53  ;;  %662 = vmatpush.msrb.mxu1 %v595_v5 }
  0x24   :  { %186 = vmatpush.bf16.msra.mxu0 %v1402_v6 }
  0x27   :  { %1303 = vmatmul.msk.f32.gmra.mxu2 %vm253_vm0, %v241_v20 }
  0x28   :  { %187 = vmatpush.bf16.msra.mxu0 %v1401_v7 }
  0x29   :  { %1297 = vmatmul.msk.f32.gmra.mxu1 %vm253_vm0, %v235_v37 }
  0x2a   :  { %1309 = vmatmul.msk.f32.gmra.mxu3 %vm253_vm0, %v247_v57 }
  0x2b   :  { %188 = vmatmul.bf16.vlgmr.msra.gmra.mxu0 %v1547_v8 }
  0x2f   :  { %1304 = vmatmul.msk.f32.gmra.mxu2 %vm253_vm0, %v242_v22 }
  0x31   :  { %1298 = vmatmul.msk.f32.gmra.mxu1 %vm253_vm0, %v236_v38 }
  0x32   :  { %1310 = vmatmul.msk.f32.gmra.mxu3 %vm253_vm0, %v248_v60 }
  0x37   :  { %1305 = vmatmul.msk.f32.gmra.mxu2 %vm253_vm0, %v243_v24 }
  0x39   :  { %1299 = vmatmul.msk.f32.gmra.mxu1 %vm253_vm0, %v237_v41 }
  0x3b   :  { %193 = vmatmul.bf16.gmra.mxu0 %v1553_v9 }
  0x3f   :  { %1306 = vmatmul.msk.f32.gmra.mxu2 %vm253_vm0, %v244_v26 }
  0x41   :  { %1300 = vmatmul.msk.f32.gmra.mxu1 %vm253_vm0, %v238_v43 }
  0x4b   :  { %198 = vmatmul.bf16.gmra.mxu0 %v1559_v10 }
  0x5b   :  { %203 = vmatmul.bf16.gmra.mxu0 %v1569_v17 }
  0x6b   :  { %208 = vmatmul.bf16.gmra.mxu0 %v1580_v21 }
  0x7b   :  { %213 = vmatmul.bf16.gmra.mxu0 %v1591_v25 }
  0x8b   :  { %218 = vmatmul.bf16.gmra.mxu0 %v1598_v30 }
  0x96   :  { %v319_v12 = vpop.f32.mrf.mxu1 }
  0x9a   :  { %v1635_v55 = vpop.f32.mrf.mxu2 }
  0x9b   :  { %223 = vmatmul.bf16.gmra.mxu0 %v1609_v35 }
  0x9e   :  { %v322_v14 = vpop.f32.mrf.mxu1 }
  0xa2   :  { %v1644_v59 = vpop.f32.mrf.mxu2 }
  0xa6   :  { %v325_v23 = vpop.f32.mrf.mxu1 }
  0xa8   :  { %v189_v39 = vpop.f32.mrf.mxu0 }
  0xa9   :  { %1311 = vmatmul.msk.f32.vlgmr.msrb.gmra.mxu2 %vm253_vm0, %v189_v39 }
  0xaa   :  { %v1648_v62 = vpop.f32.mrf.mxu2 }
  0xae   :  { %v328_v32 = vpop.f32.mrf.mxu1 }
  0xb0   :  { %v191_v42 = vpop.f32.mrf.mxu0 }
  0xb1   :  { %1312 = vmatmul.msk.f32.gmra.mxu2 %vm253_vm0, %v191_v42 }
  0xb2   :  { %v1651_v2 = vpop.f32.mrf.mxu2 }
  0xb6   :  { %v331_v39 = vpop.f32.mrf.mxu1 }
  0xb8   :  { %v194_v44 = vpop.f32.mrf.mxu0 }
  0xb9   :  { %1313 = vmatmul.msk.f32.gmra.mxu2 %vm253_vm0, %v194_v44 }
  0xba   :  { %v1654_v7 = vpop.f32.mrf.mxu2 }
  0xc0   :  { %v196_v45 = vpop.f32.mrf.mxu0 }
  0xc1   :  { %1314 = vmatmul.msk.f32.gmra.mxu2 %vm253_vm0, %v196_v45 }
  0xc2   :  { %v1658_v13 = vpop.f32.mrf.mxu2 }
  0xc8   :  { %v199_v46 = vpop.f32.mrf.mxu0 }
  0xc9   :  { %1315 = vmatmul.msk.f32.gmra.mxu2 %vm253_vm0, %v199_v46  ;;  %v334_v46 = vpop.f32.mrf.mxu1 }
  0xd0   :  { %v201_v47 = vpop.f32.mrf.mxu0 }
  0xd1   :  { %1316 = vmatmul.msk.f32.gmra.mxu2 %vm253_vm0, %v201_v47 }
  0xd8   :  { %v204_v48 = vpop.f32.mrf.mxu0 }
  0xd9   :  { %1317 = vmatmul.msk.f32.gmra.mxu2 %vm253_vm0, %v204_v48 }
  0xe0   :  { %v206_v49 = vpop.f32.mrf.mxu0 }
  0xe1   :  { %1318 = vmatmul.msk.f32.gmra.mxu2 %vm253_vm0, %v206_v49 }
  0xe8   :  { %v209_v52 = vpop.f32.mrf.mxu0 }
  0xe9   :  { %1319 = vmatmul.msk.f32.gmra.mxu2 %vm253_vm0, %v209_v52 }
  0xf0   :  { %v211_v54 = vpop.f32.mrf.mxu0 }
  0xf1   :  { %1320 = vmatmul.msk.f32.gmra.mxu2 %vm253_vm0, %v211_v54 }
  0xf8   :  { %v214_v58 = vpop.f32.mrf.mxu0 }
  0xf9   :  { %1321 = vmatmul.msk.f32.gmra.mxu2 %vm253_vm0, %v214_v58 }
 0x100   :  { %v216_v61 = vpop.f32.mrf.mxu0 }
 0x101   :  { %1322 = vmatmul.msk.f32.gmra.mxu2 %vm253_vm0, %v216_v61 }
 0x108   :  { %v219_v63 = vpop.f32.mrf.mxu0 }
 0x109   :  { %1323 = vmatmul.msk.f32.gmra.mxu2 %vm253_vm0, %v219_v63 }
 0x110   :  { %v221_v4 = vpop.f32.mrf.mxu0 }
 0x111   :  { %1324 = vmatmul.msk.f32.gmra.mxu2 %vm253_vm0, %v221_v4 }
 0x118   :  { %v224_v6 = vpop.f32.mrf.mxu0 }
 0x119   :  { %1325 = vmatmul.msk.f32.gmra.mxu2 %vm253_vm0, %v224_v6 }
 0x120   :  { %v226_v11 = vpop.f32.mrf.mxu0 }
 0x121   :  { %1326 = vmatmul.msk.f32.gmra.mxu2 %vm253_vm0, %v226_v11 }
 0x12c   :  { %v432_v16 = vpop.f32.mrf.mxu2 }
 0x12d   :  { %v433_v18 = vadd.f32 %v432_v16, %v319_v12 }
 0x12f   :  { %v484_v19 = vadd.f32 %v1663_v15, %v433_v18  ;;  %v355_v18 = vpop.f32.mrf.mxu3 }
 0x131   :  { %v500_v20 = vmax.f32 %v484_v19, 0.0 }
 0x133   :  { %1327 = vmatmul.msk.f32.vlgmr.msrb.gmra.mxu1 %vm253_vm0, %v500_v20 }
 0x134   :  { %v435_v22 = vpop.f32.mrf.mxu2 }
 0x135   :  { %v436_v24 = vadd.f32 %v435_v22, %v322_v14 }
 0x137   :  { %v485_v26 = vadd.f32 %v1663_v15, %v436_v24  ;;  %v358_v24 = vpop.f32.mrf.mxu3 }
 0x139   :  { %v501_v27 = vmax.f32 %v485_v26, 0.0 }
 0x13b   :  { %1328 = vmatmul.msk.f32.gmra.mxu1 %vm253_vm0, %v501_v27  ;;  %v1669_v28 = vpack.c.bf16 %v501_v27, %v500_v20 }
 0x13c   :  { %v438_v29 = vpop.f32.mrf.mxu2 }
 0x13d   :  { %v439_v31 = vadd.f32 %v438_v29, %v325_v23 }
 0x13f   :  { %v486_v33 = vadd.f32 %v1663_v15, %v439_v31 }
 0x141   :  { %v502_v34 = vmax.f32 %v486_v33, 0.0 }
 0x143   :  { %1329 = vmatmul.msk.f32.gmra.mxu1 %vm253_vm0, %v502_v34 }
 0x144   :  { %v441_v36 = vpop.f32.mrf.mxu2 }
 0x145   :  { %v442_v37 = vadd.f32 %v441_v36, %v328_v32  ;;  %v361_v32 = vpop.f32.mrf.mxu3 }
 0x147   :  { %v487_v38 = vadd.f32 %v1663_v15, %v442_v37 }
 0x149   :  { %v503_v40 = vmax.f32 %v487_v38, 0.0 }
 0x14b   :  { %1330 = vmatmul.msk.f32.gmra.mxu1 %vm253_vm0, %v503_v40  ;;  %v1675_v41 = vpack.c.bf16 %v503_v40, %v502_v34 }
 0x14c   :  { %v444_v42 = vpop.f32.mrf.mxu2 }
 0x14d   :  { %v445_v43 = vadd.f32 %v444_v42, %v331_v39  ;;  %v364_v38 = vpop.f32.mrf.mxu3 }
 0x14f   :  { %v488_v44 = vadd.f32 %v1663_v15, %v445_v43 }
 0x151   :  { %v504_v45 = vmax.f32 %v488_v44, 0.0 }
 0x153   :  { %1331 = vmatmul.msk.f32.gmra.mxu1 %vm253_vm0, %v504_v45 }
 0x154   :  { %v447_v47 = vpop.f32.mrf.mxu2 }
 0x155   :  { %v448_v48 = vadd.f32 %v447_v47, %v334_v46 }
 0x157   :  { %v489_v49 = vadd.f32 %v1663_v15, %v448_v48  ;;  %v576_v48 = vld [vmem:[#allocation2 + $0x30] sm:$0xff] }
 0x159   :  { %v505_v50 = vmax.f32 %v489_v49, 0.0  ;;  %v575_v49 = vld [vmem:[#allocation2 + $0x28] sm:$0xff] }
 0x15b   :  { %1332 = vmatmul.msk.f32.gmra.mxu1 %vm253_vm0, %v505_v50  ;;  %v1681_v51 = vpack.c.bf16 %v505_v50, %v504_v45 }
 0x15c   :  { %v450_v52 = vpop.f32.mrf.mxu2 }
 0x15d   :  { %v451_v53 = vadd.f32 %v450_v52, %v1635_v55 }
 0x15f   :  { %v490_v54 = vadd.f32 %v1663_v15, %v451_v53 }
 0x161   :  { %v506_v56 = vmax.f32 %v490_v54, 0.0 }
 0x163   :  { %1333 = vmatmul.msk.f32.gmra.mxu1 %vm253_vm0, %v506_v56 }
 0x164   :  { %v453_v57 = vpop.f32.mrf.mxu2 }
 0x165   :  { %v454_v58 = vadd.f32 %v453_v57, %v1644_v59 }
 0x167   :  { %v491_v60 = vadd.f32 %v1663_v15, %v454_v58 }
 0x169   :  { %v507_v61 = vmax.f32 %v491_v60, 0.0 }
 0x16b   :  { %1334 = vmatmul.msk.f32.gmra.mxu1 %vm253_vm0, %v507_v61  ;;  %v519_v63 = vpack.c.bf16 %v507_v61, %v506_v56 }
 0x16c   :  { %v456_v0 = vpop.f32.mrf.mxu2 }
 0x16d   :  { %v457_v1 = vadd.f32 %v456_v0, %v1648_v62 }
 0x16f   :  { %v492_v3 = vadd.f32 %v1663_v15, %v457_v1  ;;  %v944_v1 = vld [vmem:[#allocation4 + $0x58] sm:$0xff] }
 0x171   :  { %v508_v55 = vmax.f32 %v492_v3, 0.0  ;;  %v943_v3 = vld [vmem:[#allocation4 + $0x50] sm:$0xff] }
 0x173   :  { %1335 = vmatmul.msk.f32.gmra.mxu1 %vm253_vm0, %v508_v55 }
 0x174   :  { %v459_v4 = vpop.f32.mrf.mxu2 }
 0x175   :  { %v460_v5 = vadd.f32 %v459_v4, %v1651_v2  ;;  %v942_v4 = vld [vmem:[#allocation4 + $0x48] sm:$0xff] }
 0x177   :  { %v493_v6 = vadd.f32 %v1663_v15, %v460_v5 }
 0x179   :  { %v509_v59 = vmax.f32 %v493_v6, 0.0  ;;  %v941_v6 = vld [vmem:[#allocation4 + $0x40] sm:$0xff] }
 0x17b   :  { %1336 = vmatmul.msk.f32.gmra.mxu1 %vm253_vm0, %v509_v59  ;;  %v520_v47 = vpack.c.bf16 %v509_v59, %v508_v55 }
 0x17c   :  { %v462_v11 = vpop.f32.mrf.mxu2 }
 0x17d   :  { %v463_v12 = vadd.f32 %v462_v11, %v1654_v7 }
 0x17f   :  { %v494_v14 = vadd.f32 %v1663_v15, %v463_v12 }
 0x181   :  { %v510_v16 = vmax.f32 %v494_v14, 0.0 }
 0x183   :  { %1337 = vmatmul.msk.f32.gmra.mxu1 %vm253_vm0, %v510_v16 }
 0x184   :  { %v465_v62 = vpop.f32.mrf.mxu2 }
 0x185   :  { %v466_v19 = vadd.f32 %v465_v62, %v1658_v13 }
 0x187   :  { %v495_v20 = vadd.f32 %v1663_v15, %v466_v19 }
 0x189   :  { %v511_v2 = vmax.f32 %v495_v20, 0.0 }
 0x18b   :  { %1338 = vmatmul.msk.f32.gmra.mxu1 %vm253_vm0, %v511_v2  ;;  %v521_v46 = vpack.c.bf16 %v511_v2, %v510_v16  ;;  %v1739_v16 = vld [vmem:[%s1895_s4 + $0x1] ss:$0 sm:$0xff] }
 0x18c   :  { %v468_v22 = vpop.f32.mrf.mxu2 }
 0x18d   :  { %v469_v23 = vadd.f32 %v468_v22, %v355_v18 }
 0x18f   :  { %v496_v26 = vadd.f32 %v1663_v15, %v469_v23 }
 0x191   :  { %v512_v7 = vmax.f32 %v496_v26, 0.0 }
 0x193   :  { %1339 = vmatmul.msk.f32.gmra.mxu1 %vm253_vm0, %v512_v7 }
 0x194   :  { %v471_v27 = vpop.f32.mrf.mxu2 }
 0x195   :  { %v472_v29 = vadd.f32 %v471_v27, %v358_v24 }
 0x197   :  { %v497_v31 = vadd.f32 %v1663_v15, %v472_v29 }
 0x199   :  { %v513_v33 = vmax.f32 %v497_v31, 0.0 }
 0x19b   :  { %1340 = vmatmul.msk.f32.gmra.mxu1 %vm253_vm0, %v513_v33  ;;  %v522_v45 = vpack.c.bf16 %v513_v33, %v512_v7 }
 0x19c   :  { %v474_v13 = vpop.f32.mrf.mxu2 }
 0x19d   :  { %v475_v34 = vadd.f32 %v474_v13, %v361_v32 }
 0x19f   :  { %v498_v36 = vadd.f32 %v1663_v15, %v475_v34 }
 0x1a1   :  { %v514_v37 = vmax.f32 %v498_v36, 0.0 }
 0x1a3   :  { %1341 = vmatmul.msk.f32.gmra.mxu1 %vm253_vm0, %v514_v37 }
 0x1a4   :  { %v477_v39 = vpop.f32.mrf.mxu2 }
 0x1a5   :  { %v478_v40 = vadd.f32 %v477_v39, %v364_v38 }
 0x1a7   :  { %v499_v42 = vadd.f32 %v1663_v15, %v478_v40  ;;  %v577_v15 = vld [vmem:[#allocation2 + $0x38] sm:$0xff] }
 0x1a8   :  { %772 = vmatpush.msra.mxu2 %v577_v15 }
 0x1a9   :  { %v515_v43 = vmax.f32 %v499_v42, 0.0 }
 0x1aa   :  { %773 = vmatpush.msra.mxu2 %v576_v48 }
 0x1ab   :  { %1342 = vmatmul.msk.f32.gmra.mxu1 %vm253_vm0, %v515_v43  ;;  %v523_v44 = vpack.c.bf16 %v515_v43, %v514_v37 }
 0x1ac   :  { %774 = vmatpush.msra.mxu2 %v575_v49 }
 0x1ad   :  { %524 = vmatpush.bf16.msrb.mxu3 %v523_v44 }
 0x1b0   :  { %v664_v55 = vpop.f32.mrf.mxu1 }
 0x1b1   :  { %525 = vmatpush.bf16.msrb.mxu3 %v522_v45 }
 0x1b5   :  { %526 = vmatpush.bf16.msrb.mxu3 %v521_v46 }
 0x1b8   :  { %v667_v59 = vpop.f32.mrf.mxu1 }
 0x1b9   :  { %527 = vmatpush.bf16.msrb.mxu3 %v520_v47 }
 0x1bd   :  { %528 = vmatpush.bf16.msrb.mxu3 %v519_v63 }
 0x1c0   :  { %v670_v14 = vpop.f32.mrf.mxu1 }
 0x1c1   :  { %529 = vmatpush.bf16.msrb.mxu3 %v1681_v51 }
 0x1c5   :  { %530 = vmatpush.bf16.msrb.mxu3 %v1675_v41 }
 0x1c8   :  { %v673_v62 = vpop.f32.mrf.mxu1 }
 0x1c9   :  { %531 = vmatpush.bf16.msrb.mxu3 %v1669_v28  ;;  %v574_v28 = vld [vmem:[#allocation2 + $0x20] sm:$0xff] }
 0x1ca   :  { %775 = vmatpush.msra.mxu2 %v574_v28 }
 0x1cc   :  { %532 = vmatmul.bf16.vlgmr.msrb.gmra.mxu3 %v1547_v8 }
 0x1cd   :  { %1005 = vmatpush.msra.mxu3 %v944_v1 }
 0x1cf   :  { %1006 = vmatpush.msra.mxu3 %v943_v3 }
 0x1d0   :  { %v676_v24 = vpop.f32.mrf.mxu1 }
 0x1d1   :  { %1007 = vmatpush.msra.mxu3 %v942_v4 }
 0x1d3   :  { %1008 = vmatpush.msra.mxu3 %v941_v6 }
 0x1d8   :  { %v679_v33 = vpop.f32.mrf.mxu1 }
 0x1dc   :  { %537 = vmatmul.bf16.gmra.mxu3 %v1553_v9 }
 0x1e0   :  { %v682_v39 = vpop.f32.mrf.mxu1 }
 0x1e8   :  { %v685_v46 = vpop.f32.mrf.mxu1 }
 0x1ec   :  { %542 = vmatmul.bf16.gmra.mxu3 %v1559_v10 }
 0x1fc   :  { %547 = vmatmul.bf16.gmra.mxu3 %v1569_v17 }
 0x20c   :  { %552 = vmatmul.bf16.gmra.mxu3 %v1580_v21 }
 0x21c   :  { %557 = vmatmul.bf16.gmra.mxu3 %v1591_v25 }
 0x22c   :  { %562 = vmatmul.bf16.gmra.mxu3 %v1598_v30 }
 0x23c   :  { %567 = vmatmul.bf16.gmra.mxu3 %v1609_v35 }
 0x24f   :  { %v533_v41 = vpop.f32.mrf.mxu3 }
 0x250   :  { %1343 = vmatmul.msk.f32.vlgmr.msra.gmra.mxu2 %vm253_vm0, %v533_v41 }
 0x257   :  { %v535_v50 = vpop.f32.mrf.mxu3 }
 0x258   :  { %1344 = vmatmul.msk.f32.gmra.mxu2 %vm253_vm0, %v535_v50 }
 0x25f   :  { %v538_v51 = vpop.f32.mrf.mxu3 }
 0x260   :  { %1345 = vmatmul.msk.f32.gmra.mxu2 %vm253_vm0, %v538_v51  ;;  %v688_v51 = vpop.f32.mrf.mxu1 }
 0x267   :  { %v540_v52 = vpop.f32.mrf.mxu3 }
 0x268   :  { %1346 = vmatmul.msk.f32.gmra.mxu2 %vm253_vm0, %v540_v52 }
 0x26f   :  { %v543_v53 = vpop.f32.mrf.mxu3 }
 0x270   :  { %1347 = vmatmul.msk.f32.gmra.mxu2 %vm253_vm0, %v543_v53 }
 0x277   :  { %v545_v54 = vpop.f32.mrf.mxu3 }
 0x278   :  { %1348 = vmatmul.msk.f32.gmra.mxu2 %vm253_vm0, %v545_v54 }
 0x27f   :  { %v548_v56 = vpop.f32.mrf.mxu3 }
 0x280   :  { %1349 = vmatmul.msk.f32.gmra.mxu2 %vm253_vm0, %v548_v56 }
 0x287   :  { %v550_v57 = vpop.f32.mrf.mxu3 }
 0x288   :  { %1350 = vmatmul.msk.f32.gmra.mxu2 %vm253_vm0, %v550_v57 }
 0x28f   :  { %v553_v58 = vpop.f32.mrf.mxu3 }
 0x290   :  { %1351 = vmatmul.msk.f32.gmra.mxu2 %vm253_vm0, %v553_v58  ;;  %v691_v58 = vpop.f32.mrf.mxu1 }
 0x297   :  { %v555_v60 = vpop.f32.mrf.mxu3 }
 0x298   :  { %1352 = vmatmul.msk.f32.gmra.mxu2 %vm253_vm0, %v555_v60 }
 0x29f   :  { %v558_v61 = vpop.f32.mrf.mxu3 }
 0x2a0   :  { %1353 = vmatmul.msk.f32.gmra.mxu2 %vm253_vm0, %v558_v61 }
 0x2a7   :  { %v560_v63 = vpop.f32.mrf.mxu3 }
 0x2a8   :  { %1354 = vmatmul.msk.f32.gmra.mxu2 %vm253_vm0, %v560_v63 }
 0x2af   :  { %v563_v0 = vpop.f32.mrf.mxu3 }
 0x2b0   :  { %1355 = vmatmul.msk.f32.gmra.mxu2 %vm253_vm0, %v563_v0 }
 0x2b7   :  { %v565_v5 = vpop.f32.mrf.mxu3 }
 0x2b8   :  { %1356 = vmatmul.msk.f32.gmra.mxu2 %vm253_vm0, %v565_v5 }
 0x2bf   :  { %v568_v11 = vpop.f32.mrf.mxu3 }
 0x2c0   :  { %1357 = vmatmul.msk.f32.gmra.mxu2 %vm253_vm0, %v568_v11 }
 0x2c7   :  { %v570_v12 = vpop.f32.mrf.mxu3 }
 0x2c8   :  { %1358 = vmatmul.msk.f32.gmra.mxu2 %vm253_vm0, %v570_v12 }
 0x2d3   :  { %v777_v18 = vpop.f32.mrf.mxu2 }
 0x2d4   :  { %v778_v19 = vadd.f32 %v777_v18, %v664_v55  ;;  %v694_v55 = vpop.f32.mrf.mxu1 }
 0x2d6   :  { %v830_v20 = vadd.f32 %v1739_v16, %v778_v19 }
 0x2d8   :  { %v846_v2 = vmax.f32 %v830_v20, 0.0 }
 0x2da   :  { %1360 = vmatmul.msk.f32.vlgmr.msra.gmra.mxu3 %vm253_vm0, %v846_v2 }
 0x2db   :  { %v780_v22 = vpop.f32.mrf.mxu2 }
 0x2dc   :  { %v781_v23 = vadd.f32 %v780_v22, %v667_v59  ;;  %v697_v11 = vpop.f32.mrf.mxu1 }
 0x2de   :  { %v831_v26 = vadd.f32 %v1739_v16, %v781_v23 }
 0x2e0   :  { %v847_v7 = vmax.f32 %v831_v26, 0.0 }
 0x2e2   :  { %1361 = vmatmul.msk.f32.gmra.mxu3 %vm253_vm0, %v847_v7  ;;  %v1745_v27 = vpack.c.bf16 %v847_v7, %v846_v2 }
 0x2e3   :  { %v783_v29 = vpop.f32.mrf.mxu2 }
 0x2e4   :  { %v784_v31 = vadd.f32 %v783_v29, %v670_v14  ;;  %v700_v2 = vpop.f32.mrf.mxu1 }
 0x2e6   :  { %v832_v32 = vadd.f32 %v1739_v16, %v784_v31 }
 0x2e8   :  { %v848_v13 = vmax.f32 %v832_v32, 0.0 }
 0x2ea   :  { %1362 = vmatmul.msk.f32.gmra.mxu3 %vm253_vm0, %v848_v13 }
 0x2eb   :  { %v786_v34 = vpop.f32.mrf.mxu2 }
 0x2ec   :  { %v787_v36 = vadd.f32 %v786_v34, %v673_v62  ;;  %v703_v29 = vpop.f32.mrf.mxu1 }
 0x2ee   :  { %v833_v37 = vadd.f32 %v1739_v16, %v787_v36 }
 0x2f0   :  { %v849_v38 = vmax.f32 %v833_v37, 0.0 }
 0x2f2   :  { %1363 = vmatmul.msk.f32.gmra.mxu3 %vm253_vm0, %v849_v38  ;;  %v1751_v40 = vpack.c.bf16 %v849_v38, %v848_v13 }
 0x2f3   :  { %v789_v42 = vpop.f32.mrf.mxu2 }
 0x2f4   :  { %v790_v43 = vadd.f32 %v789_v42, %v676_v24  ;;  %v706_v36 = vpop.f32.mrf.mxu1 }
 0x2f6   :  { %v834_v44 = vadd.f32 %v1739_v16, %v790_v43 }
 0x2f8   :  { %v850_v45 = vmax.f32 %v834_v44, 0.0 }
 0x2fa   :  { %1364 = vmatmul.msk.f32.gmra.mxu3 %vm253_vm0, %v850_v45 }
 0x2fb   :  { %v792_v47 = vpop.f32.mrf.mxu2 }
 0x2fc   :  { %v793_v15 = vadd.f32 %v792_v47, %v679_v33  ;;  %v709_v43 = vpop.f32.mrf.mxu1 }
 0x2fe   :  { %v835_v48 = vadd.f32 %v1739_v16, %v793_v15 }
 0x300   :  { %v851_v49 = vmax.f32 %v835_v48, 0.0 }
 0x302   :  { %1365 = vmatmul.msk.f32.gmra.mxu3 %vm253_vm0, %v851_v49  ;;  %v1757_v28 = vpack.c.bf16 %v851_v49, %v850_v45 }
 0x303   :  { %v795_v41 = vpop.f32.mrf.mxu2 }
 0x304   :  { %v796_v50 = vadd.f32 %v795_v41, %v682_v39 }
 0x306   :  { %v836_v52 = vadd.f32 %v1739_v16, %v796_v50 }
 0x308   :  { %v852_v53 = vmax.f32 %v836_v52, 0.0 }
 0x30a   :  { %1366 = vmatmul.msk.f32.gmra.mxu3 %vm253_vm0, %v852_v53 }
 0x30b   :  { %v798_v54 = vpop.f32.mrf.mxu2 }
 0x30c   :  { %v799_v56 = vadd.f32 %v798_v54, %v685_v46 }
 0x30e   :  { %v837_v57 = vadd.f32 %v1739_v16, %v799_v56 }
 0x310   :  { %v853_v60 = vmax.f32 %v837_v57, 0.0 }
 0x312   :  { %1367 = vmatmul.msk.f32.gmra.mxu3 %vm253_vm0, %v853_v60  ;;  %v865_v61 = vpack.c.bf16 %v853_v60, %v852_v53 }
 0x313   :  { %v801_v63 = vpop.f32.mrf.mxu2 }
 0x314   :  { %v802_v0 = vadd.f32 %v801_v63, %v688_v51 }
 0x316   :  { %v838_v1 = vadd.f32 %v1739_v16, %v802_v0 }
 0x318   :  { %v854_v3 = vmax.f32 %v838_v1, 0.0  ;;  %v1809_v1 = vld [vmem:[%s1895_s4 + $0x2] ss:$0 sm:$0xff] }
 0x31a   :  { %1368 = vmatmul.msk.f32.gmra.mxu3 %vm253_vm0, %v854_v3 }
 0x31b   :  { %v804_v4 = vpop.f32.mrf.mxu2 }
 0x31c   :  { %v805_v5 = vadd.f32 %v804_v4, %v691_v58 }
 0x31e   :  { %v839_v6 = vadd.f32 %v1739_v16, %v805_v5 }
 0x320   :  { %v855_v59 = vmax.f32 %v839_v6, 0.0 }
 0x322   :  { %1369 = vmatmul.msk.f32.gmra.mxu3 %vm253_vm0, %v855_v59  ;;  %v866_v41 = vpack.c.bf16 %v855_v59, %v854_v3 }
 0x323   :  { %v807_v12 = vpop.f32.mrf.mxu2 }
 0x324   :  { %v808_v14 = vadd.f32 %v807_v12, %v694_v55 }
 0x326   :  { %v840_v62 = vadd.f32 %v1739_v16, %v808_v14 }
 0x328   :  { %v856_v18 = vmax.f32 %v840_v62, 0.0 }
 0x32a   :  { %1370 = vmatmul.msk.f32.gmra.mxu3 %vm253_vm0, %v856_v18 }
 0x32b   :  { %v810_v19 = vpop.f32.mrf.mxu2 }
 0x32c   :  { %v811_v20 = vadd.f32 %v810_v19, %v697_v11 }
 0x32e   :  { %v841_v22 = vadd.f32 %v1739_v16, %v811_v20 }
 0x330   :  { %v857_v23 = vmax.f32 %v841_v22, 0.0 }
 0x332   :  { %1371 = vmatmul.msk.f32.gmra.mxu3 %vm253_vm0, %v857_v23  ;;  %v867_v49 = vpack.c.bf16 %v857_v23, %v856_v18 }
 0x333   :  { %v813_v24 = vpop.f32.mrf.mxu2 }
 0x334   :  { %v814_v26 = vadd.f32 %v813_v24, %v700_v2 }
 0x336   :  { %v842_v7 = vadd.f32 %v1739_v16, %v814_v26 }
 0x338   :  { %v858_v31 = vmax.f32 %v842_v7, 0.0 }
 0x33a   :  { %1372 = vmatmul.msk.f32.gmra.mxu3 %vm253_vm0, %v858_v31 }
 0x33b   :  { %v816_v32 = vpop.f32.mrf.mxu2 }
 0x33c   :  { %v817_v33 = vadd.f32 %v816_v32, %v703_v29 }
 0x33e   :  { %v843_v13 = vadd.f32 %v1739_v16, %v817_v33 }
 0x340   :  { %v859_v34 = vmax.f32 %v843_v13, 0.0 }
 0x342   :  { %1373 = vmatmul.msk.f32.gmra.mxu3 %vm253_vm0, %v859_v34  ;;  %v868_v48 = vpack.c.bf16 %v859_v34, %v858_v31 }
 0x343   :  { %v819_v37 = vpop.f32.mrf.mxu2 }
 0x344   :  { %v820_v38 = vadd.f32 %v819_v37, %v706_v36 }
 0x346   :  { %v844_v39 = vadd.f32 %v1739_v16, %v820_v38 }
 0x348   :  { %v860_v42 = vmax.f32 %v844_v39, 0.0 }
 0x34a   :  { %1374 = vmatmul.msk.f32.gmra.mxu3 %vm253_vm0, %v860_v42 }
 0x34b   :  { %v822_v44 = vpop.f32.mrf.mxu2 }
 0x34c   :  { %v823_v45 = vadd.f32 %v822_v44, %v709_v43 }
 0x34e   :  { %v845_v46 = vadd.f32 %v1739_v16, %v823_v45  ;;  %v923_v16 = vld [vmem:[#allocation2 + $0x58] sm:$0xff] }
 0x34f   :  { %1417 = vmatpush.msra.mxu1 %v923_v16 }
 0x350   :  { %v861_v47 = vmax.f32 %v845_v46, 0.0 }
 0x352   :  { %1375 = vmatmul.msk.f32.gmra.mxu3 %vm253_vm0, %v861_v47  ;;  %v869_v15 = vpack.c.bf16 %v861_v47, %v860_v42 }
 0x354   :  { %870 = vmatpush.bf16.msrb.mxu0 %v869_v15 }
 0x358   :  { %871 = vmatpush.bf16.msrb.mxu0 %v868_v48 }
 0x35c   :  { %872 = vmatpush.bf16.msrb.mxu0 %v867_v49 }
 0x35d   :  { %v1010_v54 = vpop.f32.mrf.mxu3 }
 0x360   :  { %873 = vmatpush.bf16.msrb.mxu0 %v866_v41 }
 0x364   :  { %874 = vmatpush.bf16.msrb.mxu0 %v865_v61 }
 0x365   :  { %v1013_v58 = vpop.f32.mrf.mxu3 }
 0x368   :  { %875 = vmatpush.bf16.msrb.mxu0 %v1757_v28  ;;  %v922_v28 = vld [vmem:[#allocation2 + $0x50] sm:$0xff] }
 0x369   :  { %1418 = vmatpush.msra.mxu1 %v922_v28 }
 0x36c   :  { %876 = vmatpush.bf16.msrb.mxu0 %v1751_v40  ;;  %v921_v40 = vld [vmem:[#allocation2 + $0x48] sm:$0xff] }
 0x36d   :  { %1419 = vmatpush.msra.mxu1 %v921_v40  ;;  %v1016_v61 = vpop.f32.mrf.mxu3 }
 0x370   :  { %877 = vmatpush.bf16.msrb.mxu0 %v1745_v27  ;;  %v920_v27 = vld [vmem:[#allocation2 + $0x40] sm:$0xff] }
 0x371   :  { %1420 = vmatpush.msra.mxu1 %v920_v27 }
 0x373   :  { %878 = vmatmul.bf16.vlgmr.msrb.gmra.mxu0 %v1547_v8 }
 0x374   :  { %1118 = vmatpush.msra.mxu0 %v923_v16 }
 0x375   :  { %v1019_v0 = vpop.f32.mrf.mxu3 }
 0x376   :  { %1119 = vmatpush.msra.mxu0 %v922_v28 }
 0x378   :  { %1120 = vmatpush.msra.mxu0 %v921_v40 }
 0x37a   :  { %1121 = vmatpush.msra.mxu0 %v920_v27 }
 0x37d   :  { %v1022_v11 = vpop.f32.mrf.mxu3 }
 0x383   :  { %883 = vmatmul.bf16.gmra.mxu0 %v1553_v9 }
 0x385   :  { %v1025_v20 = vpop.f32.mrf.mxu3 }
 0x38d   :  { %v1028_v7 = vpop.f32.mrf.mxu3 }
 0x393   :  { %888 = vmatmul.bf16.gmra.mxu0 %v1559_v10 }
 0x395   :  { %v1031_v13 = vpop.f32.mrf.mxu3 }
 0x39d   :  { %v1034_v43 = vpop.f32.mrf.mxu3 }
 0x3a3   :  { %893 = vmatmul.bf16.gmra.mxu0 %v1569_v17 }
 0x3a5   :  { %v1037_v48 = vpop.f32.mrf.mxu3 }
 0x3ad   :  { %v1040_v27 = vpop.f32.mrf.mxu3 }
 0x3b3   :  { %898 = vmatmul.bf16.gmra.mxu0 %v1580_v21 }
 0x3c3   :  { %903 = vmatmul.bf16.gmra.mxu0 %v1591_v25 }
 0x3d3   :  { %908 = vmatmul.bf16.gmra.mxu0 %v1598_v30 }
 0x3e3   :  { %913 = vmatmul.bf16.gmra.mxu0 %v1609_v35 }
 0x3f0   :  { %v879_v8 = vpop.f32.mrf.mxu0 }
 0x3f3   :  { %1376 = vmatmul.msk.f32.vlgmr.msra.gmra.mxu0 %vm253_vm0, %v879_v8 }
 0x3f8   :  { %v881_v9 = vpop.f32.mrf.mxu0 }
 0x3f9   :  { %1377 = vmatmul.msk.f32.vlgmr.msra.gmra.mxu1 %vm253_vm0, %v881_v9 }
 0x400   :  { %v884_v10 = vpop.f32.mrf.mxu0 }
 0x401   :  { %1378 = vmatmul.msk.f32.gmra.mxu1 %vm253_vm0, %v884_v10 }
 0x408   :  { %v886_v17 = vpop.f32.mrf.mxu0 }
 0x409   :  { %1379 = vmatmul.msk.f32.gmra.mxu1 %vm253_vm0, %v886_v17 }
 0x410   :  { %v889_v21 = vpop.f32.mrf.mxu0 }
 0x411   :  { %1380 = vmatmul.msk.f32.gmra.mxu1 %vm253_vm0, %v889_v21  ;;  %v1043_v21 = vpop.f32.mrf.mxu3 }
 0x418   :  { %v891_v25 = vpop.f32.mrf.mxu0 }
 0x419   :  { %1381 = vmatmul.msk.f32.gmra.mxu1 %vm253_vm0, %v891_v25 }
 0x420   :  { %v894_v30 = vpop.f32.mrf.mxu0 }
 0x421   :  { %1382 = vmatmul.msk.f32.gmra.mxu1 %vm253_vm0, %v894_v30 }
 0x428   :  { %v896_v35 = vpop.f32.mrf.mxu0 }
 0x429   :  { %1383 = vmatmul.msk.f32.gmra.mxu1 %vm253_vm0, %v896_v35 }
 0x430   :  { %v899_v50 = vpop.f32.mrf.mxu0 }
 0x431   :  { %1384 = vmatmul.msk.f32.gmra.mxu1 %vm253_vm0, %v899_v50 }
 0x438   :  { %v901_v51 = vpop.f32.mrf.mxu0 }
 0x439   :  { %1385 = vmatmul.msk.f32.gmra.mxu1 %vm253_vm0, %v901_v51 }
 0x440   :  { %v904_v52 = vpop.f32.mrf.mxu0 }
 0x441   :  { %1386 = vmatmul.msk.f32.gmra.mxu1 %vm253_vm0, %v904_v52 }
 0x448   :  { %v906_v53 = vpop.f32.mrf.mxu0 }
 0x449   :  { %1387 = vmatmul.msk.f32.gmra.mxu1 %vm253_vm0, %v906_v53  ;;  %v1046_v53 = vpop.f32.mrf.mxu3 }
 0x450   :  { %v909_v56 = vpop.f32.mrf.mxu0 }
 0x451   :  { %1388 = vmatmul.msk.f32.gmra.mxu1 %vm253_vm0, %v909_v56 }
 0x458   :  { %v911_v57 = vpop.f32.mrf.mxu0 }
 0x459   :  { %1389 = vmatmul.msk.f32.gmra.mxu1 %vm253_vm0, %v911_v57 }
 0x460   :  { %v914_v60 = vpop.f32.mrf.mxu0 }
 0x461   :  { %1390 = vmatmul.msk.f32.gmra.mxu1 %vm253_vm0, %v914_v60 }
 0x468   :  { %v916_v63 = vpop.f32.mrf.mxu0 }
 0x469   :  { %1391 = vmatmul.msk.f32.gmra.mxu1 %vm253_vm0, %v916_v63 }
 0x470   :  { %v1123_v3 = vpop.f32.mrf.mxu0 }
 0x471   :  { %v1124_v55 = vadd.f32 %v1123_v3, %v1010_v54 }
 0x473   :  { %v1176_v4 = vadd.f32 %v1809_v1, %v1124_v55 }
 0x475   :  { %v1192_v5 = vpack.c.bf16 %v1176_v4, %v1176_v4 }
 0x476   :  { %v1126_v6 = vpop.f32.mrf.mxu1 }
 0x477   :  { %1209 = vst.msk [vmem:[%s1896_s5] sm:$0xf] %vm1208_vm1, %v1192_v5  ;;  %v1127_v59 = vadd.f32 %v1126_v6, %v1013_v58 }
 0x479   :  { %v1177_v12 = vadd.f32 %v1809_v1, %v1127_v59 }
 0x47b   :  { %v1193_v14 = vpack.c.bf16 %v1177_v12, %v1177_v12 }
 0x47d   :  { %1210 = vst.msk [vmem:[%s1896_s5 + $0x4] sm:$0xf] %vm1208_vm1, %v1193_v14 }
 0x47e   :  { %v1129_v62 = vpop.f32.mrf.mxu1 }
 0x47f   :  { %v1130_v18 = vadd.f32 %v1129_v62, %v1016_v61  ;;  %v1049_v61 = vpop.f32.mrf.mxu3 }
 0x481   :  { %v1178_v19 = vadd.f32 %v1809_v1, %v1130_v18 }
 0x483   :  { %v1194_v2 = vpack.c.bf16 %v1178_v19, %v1178_v19 }
 0x485   :  { %1211 = vst.msk [vmem:[%s1896_s5 + $0x8] sm:$0xf] %vm1208_vm1, %v1194_v2 }
 0x486   :  { %v1132_v22 = vpop.f32.mrf.mxu1 }
 0x487   :  { %v1133_v23 = vadd.f32 %v1132_v22, %v1019_v0  ;;  %v1052_v5 = vpop.f32.mrf.mxu3 }
 0x489   :  { %v1179_v24 = vadd.f32 %v1809_v1, %v1133_v23 }
 0x48b   :  { %v1195_v26 = vpack.c.bf16 %v1179_v24, %v1179_v24 }
 0x48d   :  { %1212 = vst.msk [vmem:[%s1896_s5 + $0xc] sm:$0xf] %vm1208_vm1, %v1195_v26 }
 0x48e   :  { %v1135_v29 = vpop.f32.mrf.mxu1 }
 0x48f   :  { %v1136_v31 = vadd.f32 %v1135_v29, %v1022_v11  ;;  %v1055_v14 = vpop.f32.mrf.mxu3 }
 0x491   :  { %v1180_v32 = vadd.f32 %v1809_v1, %v1136_v31 }
 0x493   :  { %v1196_v33 = vpack.c.bf16 %v1180_v32, %v1180_v32 }
 0x495   :  { %1213 = vst.msk [vmem:[%s1896_s5 + $0x10] sm:$0xf] %vm1208_vm1, %v1196_v33 }
 0x496   :  { %v1138_v34 = vpop.f32.mrf.mxu1 }
 0x497   :  { %v1139_v36 = vadd.f32 %v1138_v34, %v1025_v20 }
 0x499   :  { %v1181_v37 = vadd.f32 %v1809_v1, %v1139_v36 }
 0x49b   :  { %v1197_v38 = vpack.c.bf16 %v1181_v37, %v1181_v37 }
 0x49d   :  { %1214 = vst.msk [vmem:[%s1896_s5 + $0x14] sm:$0xf] %vm1208_vm1, %v1197_v38 }
 0x49e   :  { %v1141_v39 = vpop.f32.mrf.mxu1 }
 0x49f   :  { %v1142_v42 = vadd.f32 %v1141_v39, %v1028_v7 }
 0x4a1   :  { %v1182_v44 = vadd.f32 %v1809_v1, %v1142_v42 }
 0x4a3   :  { %v1198_v45 = vpack.c.bf16 %v1182_v44, %v1182_v44 }
 0x4a5   :  { %1215 = vst.msk [vmem:[%s1896_s5 + $0x18] sm:$0xf] %vm1208_vm1, %v1198_v45 }
 0x4a6   :  { %v1144_v46 = vpop.f32.mrf.mxu1 }
 0x4a7   :  { %v1145_v47 = vadd.f32 %v1144_v46, %v1031_v13 }
 0x4a9   :  { %v1183_v15 = vadd.f32 %v1809_v1, %v1145_v47 }
 0x4ab   :  { %v1199_v49 = vpack.c.bf16 %v1183_v15, %v1183_v15 }
 0x4ad   :  { %1216 = vst.msk [vmem:[%s1896_s5 + $0x1c] sm:$0xf] %vm1208_vm1, %v1199_v49 }
 0x4ae   :  { %v1147_v41 = vpop.f32.mrf.mxu1 }
 0x4af   :  { %v1148_v16 = vadd.f32 %v1147_v41, %v1034_v43 }
 0x4b1   :  { %v1184_v28 = vadd.f32 %v1809_v1, %v1148_v16 }
 0x4b3   :  { %v1200_v40 = vpack.c.bf16 %v1184_v28, %v1184_v28 }
 0x4b5   :  { %1217 = vst.msk [vmem:[%s1896_s5 + $0x20] sm:$0xf] %vm1208_vm1, %v1200_v40 }
 0x4b6   :  { %v1150_v8 = vpop.f32.mrf.mxu1 }
 0x4b7   :  { %v1151_v9 = vadd.f32 %v1150_v8, %v1037_v48 }
 0x4b9   :  { %v1185_v10 = vadd.f32 %v1809_v1, %v1151_v9 }
 0x4bb   :  { %v1201_v17 = vpack.c.bf16 %v1185_v10, %v1185_v10 }
 0x4bd   :  { %1218 = vst.msk [vmem:[%s1896_s5 + $0x24] sm:$0xf] %vm1208_vm1, %v1201_v17 }
 0x4be   :  { %v1153_v25 = vpop.f32.mrf.mxu1 }
 0x4bf   :  { %v1154_v30 = vadd.f32 %v1153_v25, %v1040_v27 }
 0x4c1   :  { %v1186_v35 = vadd.f32 %v1809_v1, %v1154_v30 }
 0x4c3   :  { %v1202_v50 = vpack.c.bf16 %v1186_v35, %v1186_v35 }
 0x4c5   :  { %1219 = vst.msk [vmem:[%s1896_s5 + $0x28] sm:$0xf] %vm1208_vm1, %v1202_v50 }
 0x4c6   :  { %v1156_v51 = vpop.f32.mrf.mxu1 }
 0x4c7   :  { %v1157_v52 = vadd.f32 %v1156_v51, %v1043_v21 }
 0x4c9   :  { %v1187_v54 = vadd.f32 %v1809_v1, %v1157_v52 }
 0x4cb   :  { %v1203_v56 = vpack.c.bf16 %v1187_v54, %v1187_v54 }
 0x4cd   :  { %1220 = vst.msk [vmem:[%s1896_s5 + $0x2c] sm:$0xf] %vm1208_vm1, %v1203_v56 }
 0x4ce   :  { %v1159_v57 = vpop.f32.mrf.mxu1 }
 0x4cf   :  { %v1160_v58 = vadd.f32 %v1159_v57, %v1046_v53 }
 0x4d1   :  { %v1188_v60 = vadd.f32 %v1809_v1, %v1160_v58 }
 0x4d3   :  { %v1204_v63 = vpack.c.bf16 %v1188_v60, %v1188_v60 }
 0x4d5   :  { %1221 = vst.msk [vmem:[%s1896_s5 + $0x30] sm:$0xf] %vm1208_vm1, %v1204_v63 }
 0x4d6   :  { %v1162_v0 = vpop.f32.mrf.mxu1 }
 0x4d7   :  { %v1163_v3 = vadd.f32 %v1162_v0, %v1049_v61 }
 0x4d9   :  { %v1189_v55 = vadd.f32 %v1809_v1, %v1163_v3 }
 0x4db   :  { %v1205_v4 = vpack.c.bf16 %v1189_v55, %v1189_v55 }
 0x4dd   :  { %1222 = vst.msk [vmem:[%s1896_s5 + $0x34] sm:$0xf] %vm1208_vm1, %v1205_v4 }
 0x4de   :  { %v1165_v6 = vpop.f32.mrf.mxu1 }
 0x4df   :  { %v1166_v59 = vadd.f32 %v1165_v6, %v1052_v5 }
 0x4e1   :  { %v1190_v11 = vadd.f32 %v1809_v1, %v1166_v59 }
 0x4e3   :  { %v1206_v12 = vpack.c.bf16 %v1190_v11, %v1190_v11 }
 0x4e5   :  { %1223 = vst.msk [vmem:[%s1896_s5 + $0x38] sm:$0xf] %vm1208_vm1, %v1206_v12 }
 0x4e6   :  { %v1168_v62 = vpop.f32.mrf.mxu1 }
 0x4e7   :  { %v1169_v18 = vadd.f32 %v1168_v62, %v1055_v14 }
 0x4e9   :  { %v1191_v19 = vadd.f32 %v1809_v1, %v1169_v18 }
 0x4eb   :  { %v1207_v20 = vpack.c.bf16 %v1191_v19, %v1191_v19 }
 0x4ed   :  { %1224 = vst.msk [vmem:[%s1896_s5 + $0x3c] sm:$0xf] %vm1208_vm1, %v1207_v20 }
 0x4ee   :  { %1229 = vsyncpa [#allocation3], 1 }
 0x4ef   :  { %1230 = vsyncpa [#allocation5], 1 }

</bundles_post_ra>
